<compile_context>
chip_gen: v7x
topology: tpu7x:2x2x1
jax: 0.10.0
libtpu: 0.0.40
codegen_flags: <defaults>
</compile_context>

<pallas_src>
import functools

import jax
import jax.numpy as jnp
from jax import lax
from jax.experimental import pallas as pl
from jax.experimental.pallas import tpu as pltpu


def _round_up(x, m):
    return (x + m - 1) // m * m


# ---------------------------------------------------------------------------
# Kernel 1: one-shot fused QKV projection (grid over sequence tiles).
# ---------------------------------------------------------------------------
def _qkv_proj_kernel(x_ref, w_ref, q_ref, kv_ref, *, d_out_p):
    x = x_ref[...]                                                     # (tq, d_in_p), mxu dtype
    # Q panel already has 1/sqrt(d_out) folded into it by prepare_qkv_weights().
    q = jnp.dot(x, w_ref[:, 0:d_out_p], preferred_element_type=jnp.float32)
    kv = jnp.dot(x, w_ref[:, d_out_p:3 * d_out_p], preferred_element_type=jnp.float32)
    q_ref[...] = q.astype(q_ref.dtype)
    kv_ref[...] = kv.astype(kv_ref.dtype)


# ---------------------------------------------------------------------------
# Kernel 2: attention over one query tile; the K|V slab is VMEM-resident.
# ---------------------------------------------------------------------------
def _attn_kernel(q_ref, kv_ref, o_ref, *, d_out_p):
    q = q_ref[...]                                                     # (tq, d_out_p)
    k = kv_ref[:, 0:d_out_p]                                           # (S, d_out_p)
    v = kv_ref[:, d_out_p:2 * d_out_p]                                 # (S, d_out_p)

    # q @ k^T without materializing a transpose: contract last dims on the MXU.
    scores = lax.dot_general(
        q, k, dimension_numbers=(((1,), (1,)), ((), ())),
        preferred_element_type=jnp.float32,
    )                                                                  # (tq, S) f32

    # Numerically-stable softmax; normalization deferred until after the PV matmul.
    m = jnp.max(scores, axis=-1, keepdims=True)
    p = jnp.exp(scores - m)                                            # unnormalized, in (0, 1]
    denom = jnp.sum(p, axis=-1, keepdims=True)

    ctx = jnp.dot(p.astype(v.dtype), v, preferred_element_type=jnp.float32)   # (tq, d_out_p)
    o_ref[...] = (ctx * pl.reciprocal(denom, approx=True)).astype(o_ref.dtype)


# ---------------------------------------------------------------------------
# Wrappers
# ---------------------------------------------------------------------------
def prepare_qkv_weights(w_query, w_key, w_value, *, mxu_dtype=jnp.bfloat16):
    """Pad + fuse + scale-fold + cast the projection weights (do once per module)."""
    d_in, d_out = w_query.shape
    assert w_key.shape == (d_in, d_out) and w_value.shape == (d_in, d_out)
    d_in_p = _round_up(d_in, 128)        # lane-dense contraction dim (full MXU passes)
    d_out_p = _round_up(d_out, 128)      # lane-dense head dim (unmasked stores)
    scale = 1.0 / float(d_out) ** 0.5    # torch: keys.shape[-1] ** 0.5

    w = jnp.zeros((d_in_p, 3 * d_out_p), jnp.float32)
    w = w.at[:d_in, 0 * d_out_p:0 * d_out_p + d_out].set(w_query.astype(jnp.float32) * scale)
    w = w.at[:d_in, 1 * d_out_p:1 * d_out_p + d_out].set(w_key.astype(jnp.float32))
    w = w.at[:d_in, 2 * d_out_p:2 * d_out_p + d_out].set(w_value.astype(jnp.float32))
    return w.astype(mxu_dtype)


def self_attention_fwd(x, w_qkv, d_out, *, tq=256, mxu_dtype=jnp.bfloat16,
                       vmem_limit_bytes=48 * 1024 * 1024):
    """x: (S, d_in); w_qkv: prepared (d_in_p, 3*d_out_p) slab -> (S, d_out) in x.dtype."""
    S, d_in = x.shape
    d_in_p = w_qkv.shape[0]
    d_out_p = w_qkv.shape[1] // 3

    tq = max(8, min(_round_up(tq, 8), _round_up(S, 8)))
    s_pad = _round_up(S, tq)

    # Padded, MXU-dtype input slab (padded rows are dropped at the end and never act as keys).
    x_pad = jnp.zeros((s_pad, d_in_p), mxu_dtype).at[:S, :d_in].set(x.astype(mxu_dtype))

    cparams = pltpu.CompilerParams(
        dimension_semantics=("parallel",),        # tiles independent (megacore-shardable on v7x)
        vmem_limit_bytes=vmem_limit_bytes,        # safe on v5e / v6e / v7x
    )

    # ---- pass 1: one-shot QKV projection (K/V computed exactly once) --------------------
    q_all, kv_all = pl.pallas_call(
        functools.partial(_qkv_proj_kernel, d_out_p=d_out_p),
        out_shape=(jax.ShapeDtypeStruct((s_pad, d_out_p), mxu_dtype),
                   jax.ShapeDtypeStruct((s_pad, 2 * d_out_p), mxu_dtype)),
        grid_spec=pltpu.PrefetchScalarGridSpec(
            num_scalar_prefetch=0,
            grid=(s_pad // tq,),
            in_specs=[
                pl.BlockSpec((tq, d_in_p), lambda i: (i, 0)),            # x tile
                pl.BlockSpec((d_in_p, 3 * d_out_p), lambda i: (0, 0)),   # fused weights (pinned)
            ],
            out_specs=[
                pl.BlockSpec((tq, d_out_p), lambda i: (i, 0)),           # Q
                pl.BlockSpec((tq, 2 * d_out_p), lambda i: (i, 0)),       # K|V
            ],
        ),
        compiler_params=cparams,
    )(x_pad, w_qkv)

    # Keys/values come only from the real (un-padded) rows.
    kv = kv_all[:S] if s_pad != S else kv_all

    # ---- pass 2: attention over query tiles with a pinned K|V slab ----------------------
    out_padded = pl.pallas_call(
        functools.partial(_attn_kernel, d_out_p=d_out_p),
        out_shape=jax.ShapeDtypeStruct((s_pad, d_out_p), x.dtype),
        grid_spec=pltpu.PrefetchScalarGridSpec(
            num_scalar_prefetch=0,
            grid=(s_pad // tq,),
            in_specs=[
                pl.BlockSpec((tq, d_out_p), lambda i: (i, 0)),           # Q tile
                pl.BlockSpec((S, 2 * d_out_p), lambda i: (0, 0)),        # K|V slab (pinned)
            ],
            out_specs=pl.BlockSpec((tq, d_out_p), lambda i: (i, 0)),
        ),
        compiler_params=cparams,
    )(q_all, kv)

    return out_padded[:S, :d_out]


def self_attention_v1(x, w_query, w_key, w_value, *, tq=256, mxu_dtype=jnp.bfloat16):
    """Convenience wrapper matching the PyTorch module's forward semantics."""
    w_qkv = prepare_qkv_weights(w_query, w_key, w_value, mxu_dtype=mxu_dtype)
    return self_attention_fwd(x, w_qkv, w_query.shape[1], tq=tq, mxu_dtype=mxu_dtype)


def _reference(x, wq, wk, wv):
    # High-precision f32 reference of the PyTorch module.
    q = jnp.matmul(x, wq, precision="highest")
    k = jnp.matmul(x, wk, precision="highest")
    v = jnp.matmul(x, wv, precision="highest")
    scores = jnp.matmul(q, k.T, precision="highest") / jnp.sqrt(jnp.float32(k.shape[-1]))
    w = jax.nn.softmax(scores, axis=-1)
    return jnp.matmul(w, v, precision="highest")


if __name__ == "__main__":
    # small shapes consistent with the module's forward: x (seq, d_in)
    seq_len, d_in, d_out = 8, 4, 32

    key = jax.random.PRNGKey(0)
    kx, kq, kk, kval = jax.random.split(key, 4)

    x = jax.random.normal(kx, (seq_len, d_in), dtype=jnp.float32)
    # torch.rand -> uniform [0, 1)
    w_query = jax.random.uniform(kq, (d_in, d_out), dtype=jnp.float32)
    w_key = jax.random.uniform(kk, (d_in, d_out), dtype=jnp.float32)
    w_value = jax.random.uniform(kval, (d_in, d_out), dtype=jnp.float32)

    ref = _reference(x, w_query, w_key, w_value)

    # f32-operand path (MXU-precision + approx EUP reciprocal are the only deviations).
    out_f32 = jax.block_until_ready(
        self_attention_v1(x, w_query, w_key, w_value, mxu_dtype=jnp.float32))
    assert out_f32.shape == (seq_len, d_out)
    assert jnp.allclose(out_f32, ref, atol=3e-2, rtol=3e-2), "f32 path mismatch vs reference"

    # bf16-operand / f32-accumulate path (full-rate MXU on v6e/v7x); looser tolerance for the
    # bf16 rounding of MXU operands + approx reciprocal.
    out_bf16 = jax.block_until_ready(
        self_attention_v1(x, w_query, w_key, w_value, mxu_dtype=jnp.bfloat16))
    assert out_bf16.shape == (seq_len, d_out)
    assert jnp.allclose(out_bf16, ref, atol=1.5e-1, rtol=1.5e-1), "bf16 path mismatch vs reference"

    print("KERNEL_OK")
</pallas_src>

<mosaic_0001>
module attributes {stable_mosaic.version = 11 : i64} {
  func.func @_qkv_proj_kernel(%arg0: i32, %arg1: memref<8x128xf32, #tpu.memory_space<vmem>>, %arg2: memref<128x384xf32, #tpu.memory_space<vmem>>, %arg3: memref<8x128xf32, #tpu.memory_space<vmem>>, %arg4: memref<8x256xf32, #tpu.memory_space<vmem>>) attributes {dimension_semantics = [#tpu.dimension_semantics<parallel>], iteration_bounds = array<i64: 1>, scalar_prefetch = 0 : i64, scratch_operands = 0 : i64, tpu.core_type = #tpu.core_type<tc>, window_params = [{transform_indices = @transform_0, window_bounds = array<i64: 8, 128>}, {pipeline_mode = #tpu.pipeline_mode<synchronous>, transform_indices = @transform_1, window_bounds = array<i64: 128, 384>}, {transform_indices = @transform_2, window_bounds = array<i64: 8, 128>}, {transform_indices = @transform_3, window_bounds = array<i64: 8, 256>}]} {
    %c0 = arith.constant 0 : index
    %c0_0 = arith.constant 0 : index
    %0 = vector.load %arg1[%c0, %c0_0] : memref<8x128xf32, #tpu.memory_space<vmem>>, vector<8x128xf32>
    %c0_1 = arith.constant 0 : index
    %c0_2 = arith.constant 0 : index
    %1 = vector.load %arg2[%c0_1, %c0_2] : memref<128x384xf32, #tpu.memory_space<vmem>>, vector<128x128xf32>
    %cst = arith.constant dense<0.000000e+00> : vector<8x128xf32>
    %2 = tpu.matmul %0, %1, %cst {dimension_numbers = #tpu.dot_dimension_numbers<[1], [0], [0], [1], [0, 0, 1, 1], [], []>} : vector<8x128xf32>, vector<128x128xf32>, vector<8x128xf32> -> vector<8x128xf32>
    %c0_3 = arith.constant 0 : index
    %c128 = arith.constant 128 : index
    %3 = vector.load %arg2[%c0_3, %c128] : memref<128x384xf32, #tpu.memory_space<vmem>>, vector<128x256xf32>
    %cst_4 = arith.constant dense<0.000000e+00> : vector<8x256xf32>
    %4 = tpu.matmul %0, %3, %cst_4 {dimension_numbers = #tpu.dot_dimension_numbers<[1], [0], [0], [1], [0, 0, 1, 1], [], []>} : vector<8x128xf32>, vector<128x256xf32>, vector<8x256xf32> -> vector<8x256xf32>
    %c0_5 = arith.constant 0 : index
    %c0_6 = arith.constant 0 : index
    %5 = vector.load %arg3[%c0_5, %c0_6] : memref<8x128xf32, #tpu.memory_space<vmem>>, vector<8x128xf32>
    tpu.vector_store %arg3[%c0_5, %c0_6], %2 {strides = array<i32>} : memref<8x128xf32, #tpu.memory_space<vmem>>, vector<8x128xf32>,
    %c0_7 = arith.constant 0 : index
    %c0_8 = arith.constant 0 : index
    %6 = vector.load %arg4[%c0_7, %c0_8] : memref<8x256xf32, #tpu.memory_space<vmem>>, vector<8x256xf32>
    tpu.vector_store %arg4[%c0_7, %c0_8], %4 {strides = array<i32>} : memref<8x256xf32, #tpu.memory_space<vmem>>, vector<8x256xf32>,
    return
  }
  func.func @transform_0(%arg0: i32) -> (i32, i32) {
    %c0_i32 = arith.constant 0 : i32
    %c0_i32_0 = arith.constant 0 : i32
    return %arg0, %c0_i32 : i32, i32
  }
  func.func @transform_1(%arg0: i32) -> (i32, i32) {
    %c0_i32 = arith.constant 0 : i32
    %c0_i32_0 = arith.constant 0 : i32
    %c0_i32_1 = arith.constant 0 : i32
    return %c0_i32, %c0_i32_0 : i32, i32
  }
  func.func @transform_2(%arg0: i32) -> (i32, i32) {
    %c0_i32 = arith.constant 0 : i32
    %c0_i32_0 = arith.constant 0 : i32
    return %arg0, %c0_i32 : i32, i32
  }
  func.func @transform_3(%arg0: i32) -> (i32, i32) {
    %c0_i32 = arith.constant 0 : i32
    %c0_i32_0 = arith.constant 0 : i32
    return %arg0, %c0_i32 : i32, i32
  }
}

</mosaic_0001>

<bundles_post_ra>
// kernel: tpu_custom_call.1
= control target key start
LH: loop header
LB: loop body
LE: loop exit
PB: predicated region body
PF: predicated region fallthrough
CT: control target
= control target key end

     0   :  { %9 = vsyncpa [#allocation3], 0  ;;  %s576_s0 = inlined_call_operand.hbm [shape: f32[8,128], index: 0, kind: input, shape index: {}]   ;;  %s577_s1 = inlined_call_operand.hbm [shape: f32[128,384], index: 1, kind: input, shape index: {}]   ;;  %s578_s2 = inlined_call_operand.hbm [shape: f32[8,128], index: 2, kind: output, shape index: {0}]   ;;  %s579_s3 = inlined_call_operand.hbm [shape: f32[8,256], index: 3, kind: output, shape index: {1}]  }
   0x1   :  { %10 = vsyncpa [#allocation6], 0 }
   0x2   :  { %11 = vsyncpa [#allocation4], 0 }
   0x3   :  { %12 = vsyncpa [#allocation9], 0  ;;  %s477_s12 = smov [#allocation2]   ;;  %s478_s14 = smov [#allocation5]  }
   0x4   :  { %s19_s13 = sshll.u32 %s477_s12, 4  ;;  %s28_s15 = sshll.u32 %s478_s14, 4  ;;  %s20_s13 = int_to_ptr.vmem [resolvable:$true] %s19_s13  ;;  %s506_s15 = int_to_ptr.vmem [resolvable:$true] %s28_s15 }
   0x5   :  { %s381_s18 = scalar_lea.hbm %s576_s0, 128 }
   0x6   :  { %p382_p0 = scmp.ne.s32.totalorder %s576_s0, %s381_s18  ;;  %p385_p1 = scmp.lt.u32.totalorder %s381_s18, %s576_s0 }
   0x8   :  { %p387_p2 = pnand %p385_p1, %p382_p0 }
   0xa   :  { %390 = shalt.err (!%p387_p2)
}
   0xb   :  { %s391_s23 = scalar_lea.vmem %s20_s13, 128  ;;  %p396_p4 = scmp.lt.s32.totalorder %s20_s13, %s20_s13 }
   0xc   :  { %p392_p3 = scmp.ne.s32.totalorder %s20_s13, %s391_s23  ;;  %p397_p5 = scmp.lt.s32.totalorder %s391_s23, %s391_s23 }
   0xe   :  { %p398_p6 = por %p397_p5, %p396_p4 }
  0x10   :  { %p399_p7 = pnand %p398_p6, %p392_p3 }
  0x12   :  { %402 = shalt.err (!%p399_p7)
}
  0x13   :  { %22 = dma.hbm_to_vmem [thread:$0]  %s576_s0, 128, %s20_s13, [#allocation3]  }
  0x14   :  { %s403_s28 = scalar_lea.hbm %s577_s1, 6144 }
  0x15   :  { %p404_p8 = scmp.ne.s32.totalorder %s577_s1, %s403_s28  ;;  %p407_p9 = scmp.lt.u32.totalorder %s403_s28, %s577_s1 }
  0x17   :  { %p409_p10 = pnand %p407_p9, %p404_p8 }
  0x19   :  { %412 = shalt.err (!%p409_p10)
}
  0x1a   :  { %s413_s6 = scalar_lea.vmem %s506_s15, 6144  ;;  %p418_p12 = scmp.lt.s32.totalorder %s506_s15, %s506_s15 }
  0x1b   :  { %p414_p11 = scmp.ne.s32.totalorder %s506_s15, %s413_s6  ;;  %p419_p13 = scmp.lt.s32.totalorder %s413_s6, %s413_s6 }
  0x1d   :  { %p420_p0 = por %p419_p13, %p418_p12 }
  0x1f   :  { %p421_p1 = pnand %p420_p0, %p414_p11 }
  0x21   :  { %424 = shalt.err (!%p421_p1)
}
  0x22   :  { %s479_s0 = smov 384   ;;  %s480_s7 = smov 24  }
  0x23   :  { %34 = dma.hbm_to_vmem [thread:$0]  %s577_s1, 6144, %s506_s15, [#allocation6], %s479_s0, %s479_s0, %s480_s7  }
  0x24   :  { %469 = dma.done.wait [#allocation3], 128  }
  0x25   :  { %470 = vsyncadd [#allocation3], 4294967168 }
  0x26   :  { %471 = dma.done.wait [#allocation6], 6144  }
  0x27   :  { %472 = vsyncadd [#allocation6], 4294961152  ;;  %v481_v0 = vmov 0.0|0.0   ;;  %vm482_vm0 = vmmov 0   ;;  %v483_v1 = vmov 0.0   ;;  %v129_v2 = vld [vmem:[#allocation5 + $0x10] sm:$0xff] }
  0x28   :  { %316 = vmatprep.subr.bf16.mxu0 %v481_v0  ;;  %313 = vmatprep.mubr.msk.f32.mxu0 %vm482_vm0, %v483_v1  ;;  %v131_v3 = vld [vmem:[#allocation5 + $0x28] sm:$0xff]  ;;  %v42_v4 = vld [vmem:[#allocation5] sm:$0xff]  ;;  %v43_v6 = vld [vmem:[#allocation5 + $0x18] sm:$0xff]  ;;  %s484_s1 = smov [#allocation7]   ;;  %s485_s11 = smov [#allocation8]  }
  0x29   :  { %224 = vmatprep.mubr.f32.mxu1 %v483_v1  ;;  %v340_v5 = vpack.c.bf16 %v131_v3, %v129_v2  ;;  %v128_v7 = vld [vmem:[#allocation5 + $0x8] sm:$0xff]  ;;  %v130_v8 = vld [vmem:[#allocation5 + $0x20] sm:$0xff]  ;;  %v317_v9 = vpack.c.bf16 %v43_v6, %v42_v4  ;;  %v135_v12 = vld [vmem:[#allocation5 + $0x58] sm:$0xff]  ;;  %s240_s10 = sshll.u32 %s484_s1, 4  ;;  %s250_s12 = sshll.u32 %s485_s11, 4  ;;  %s241_s10 = int_to_ptr.vmem [resolvable:$true] %s240_s10  ;;  %s545_s12 = int_to_ptr.vmem [resolvable:$true] %s250_s12 }
  0x2a   :  { %v342_v10 = vpack.c.bf16 %v130_v8, %v128_v7  ;;  %v133_v11 = vld [vmem:[#allocation5 + $0x40] sm:$0xff]  ;;  %v44_v13 = vld [vmem:[#allocation5 + $0x30] sm:$0xff]  ;;  %v45_v15 = vld [vmem:[#allocation5 + $0x48] sm:$0xff]  ;;  %s425_s13 = scalar_lea.vmem %s241_s10, 128  ;;  %p430_p3 = scmp.lt.s32.totalorder %s241_s10, %s241_s10 }
  0x2b   :  { %341 = vmatprep.subr.bf16.mxu1 %v340_v5  ;;  %v344_v14 = vpack.c.bf16 %v135_v12, %v133_v11  ;;  %v132_v16 = vld [vmem:[#allocation5 + $0x38] sm:$0xff]  ;;  %v134_v17 = vld [vmem:[#allocation5 + $0x50] sm:$0xff]  ;;  %318 = vmatpush3.bf16.msra.mxu0 %v317_v9  ;;  %v320_v18 = vpack.c.bf16 %v45_v15, %v44_v13  ;;  %v139_v21 = vld [vmem:[#allocation5 + $0x88] sm:$0xff]  ;;  %p426_p2 = scmp.ne.s32.totalorder %s241_s10, %s425_s13  ;;  %p431_p4 = scmp.lt.s32.totalorder %s425_s13, %s425_s13 }
  0x2c   :  { %343 = vmatpush1.bf16.msra.mxu1 %v342_v10  ;;  %v346_v19 = vpack.c.bf16 %v134_v17, %v132_v16  ;;  %v137_v20 = vld [vmem:[#allocation5 + $0x70] sm:$0xff]  ;;  %v46_v22 = vld [vmem:[#allocation5 + $0x60] sm:$0xff]  ;;  %319 = vmatprep.subr.bf16.mxu0 %v481_v0  ;;  %v47_v24 = vld [vmem:[#allocation5 + $0x78] sm:$0xff] }
  0x2d   :  { %345 = vmatprep.subr.bf16.mxu1 %v344_v14  ;;  %v348_v23 = vpack.c.bf16 %v139_v21, %v137_v20  ;;  %v136_v25 = vld [vmem:[#allocation5 + $0x68] sm:$0xff]  ;;  %v138_v26 = vld [vmem:[#allocation5 + $0x80] sm:$0xff]  ;;  %v143_v28 = vld [vmem:[#allocation5 + $0xb8] sm:$0xff]  ;;  %v323_v29 = vpack.c.bf16 %v47_v24, %v46_v22  ;;  %p432_p5 = por %p431_p4, %p430_p3 }
  0x2e   :  { %v141_v27 = vld [vmem:[#allocation5 + $0xa0] sm:$0xff]  ;;  %v350_v30 = vpack.c.bf16 %v138_v26, %v136_v25  ;;  %v48_v31 = vld [vmem:[#allocation5 + $0x90] sm:$0xff]  ;;  %v49_v33 = vld [vmem:[#allocation5 + $0xa8] sm:$0xff] }
  0x2f   :  { %321 = vmatpush3.bf16.msra.mxu0 %v320_v18  ;;  %v352_v32 = vpack.c.bf16 %v143_v28, %v141_v27  ;;  %v140_v34 = vld [vmem:[#allocation5 + $0x98] sm:$0xff]  ;;  %v142_v35 = vld [vmem:[#allocation5 + $0xb0] sm:$0xff]  ;;  %v147_v37 = vld [vmem:[#allocation5 + $0xe8] sm:$0xff]  ;;  %v326_v38 = vpack.c.bf16 %v49_v33, %v48_v31  ;;  %p433_p6 = pnand %p432_p5, %p426_p2 }
  0x30   :  { %347 = vmatpush1.bf16.msra.mxu1 %v346_v19  ;;  %322 = vmatprep.subr.bf16.mxu0 %v481_v0  ;;  %v145_v36 = vld [vmem:[#allocation5 + $0xd0] sm:$0xff]  ;;  %v354_v39 = vpack.c.bf16 %v142_v35, %v140_v34  ;;  %v50_v40 = vld [vmem:[#allocation5 + $0xc0] sm:$0xff]  ;;  %v51_v42 = vld [vmem:[#allocation5 + $0xd8] sm:$0xff] }
  0x31   :  { %349 = vmatprep.subr.bf16.mxu1 %v348_v23  ;;  %v356_v41 = vpack.c.bf16 %v147_v37, %v145_v36  ;;  %v144_v43 = vld [vmem:[#allocation5 + $0xc8] sm:$0xff]  ;;  %v146_v44 = vld [vmem:[#allocation5 + $0xe0] sm:$0xff]  ;;  %v151_v46 = vld [vmem:[#allocation5 + $0x118] sm:$0xff]  ;;  %v329_v47 = vpack.c.bf16 %v51_v42, %v50_v40 }
  0x32   :  { %v149_v45 = vld [vmem:[#allocation5 + $0x100] sm:$0xff]  ;;  %v358_v48 = vpack.c.bf16 %v146_v44, %v144_v43  ;;  %v52_v49 = vld [vmem:[#allocation5 + $0xf0] sm:$0xff]  ;;  %v53_v51 = vld [vmem:[#allocation5 + $0x108] sm:$0xff] }
  0x33   :  { %324 = vmatpush3.bf16.msra.mxu0 %v323_v29  ;;  %v360_v50 = vpack.c.bf16 %v151_v46, %v149_v45  ;;  %v148_v52 = vld [vmem:[#allocation5 + $0xf8] sm:$0xff]  ;;  %v150_v53 = vld [vmem:[#allocation5 + $0x110] sm:$0xff]  ;;  %v155_v55 = vld [vmem:[#allocation5 + $0x148] sm:$0xff]  ;;  %v332_v56 = vpack.c.bf16 %v53_v51, %v52_v49 }
  0x34   :  { %351 = vmatpush1.bf16.msra.mxu1 %v350_v30  ;;  %325 = vmatprep.subr.bf16.mxu0 %v481_v0  ;;  %v153_v54 = vld [vmem:[#allocation5 + $0x130] sm:$0xff]  ;;  %v362_v57 = vpack.c.bf16 %v150_v53, %v148_v52  ;;  %v54_v58 = vld [vmem:[#allocation5 + $0x120] sm:$0xff]  ;;  %v55_v60 = vld [vmem:[#allocation5 + $0x138] sm:$0xff] }
  0x35   :  { %353 = vmatprep.subr.bf16.mxu1 %v352_v32  ;;  %v364_v59 = vpack.c.bf16 %v155_v55, %v153_v54  ;;  %v152_v61 = vld [vmem:[#allocation5 + $0x128] sm:$0xff]  ;;  %v154_v62 = vld [vmem:[#allocation5 + $0x140] sm:$0xff]  ;;  %v159_v1 = vld [vmem:[#allocation5 + $0x178] sm:$0xff]  ;;  %v335_v2 = vpack.c.bf16 %v55_v60, %v54_v58 }
  0x36   :  { %v157_v63 = vld [vmem:[#allocation5 + $0x160] sm:$0xff]  ;;  %v366_v3 = vpack.c.bf16 %v154_v62, %v152_v61  ;;  %v56_v4 = vld [vmem:[#allocation5 + $0x150] sm:$0xff]  ;;  %v57_v6 = vld [vmem:[#allocation5 + $0x168] sm:$0xff] }
  0x37   :  { %327 = vmatpush3.bf16.msra.mxu0 %v326_v38  ;;  %v368_v5 = vpack.c.bf16 %v159_v1, %v157_v63  ;;  %v156_v7 = vld [vmem:[#allocation5 + $0x158] sm:$0xff]  ;;  %v158_v8 = vld [vmem:[#allocation5 + $0x170] sm:$0xff]  ;;  %v338_v9 = vpack.c.bf16 %v57_v6, %v56_v4 }
  0x38   :  { %355 = vmatpush1.bf16.msra.mxu1 %v354_v39  ;;  %328 = vmatprep.subr.bf16.mxu0 %v481_v0  ;;  %v370_v10 = vpack.c.bf16 %v158_v8, %v156_v7  ;;  %v41_v11 = vld [vmem:[#allocation2] sm:$0xff] }
  0x39   :  { %357 = vmatprep.subr.bf16.mxu1 %v356_v41 }
  0x3b   :  { %330 = vmatpush3.bf16.msra.mxu0 %v329_v47 }
  0x3c   :  { %359 = vmatpush1.bf16.msra.mxu1 %v358_v48  ;;  %331 = vmatprep.subr.bf16.mxu0 %v481_v0 }
  0x3d   :  { %361 = vmatprep.subr.bf16.mxu1 %v360_v50 }
  0x3f   :  { %333 = vmatpush3.bf16.msra.mxu0 %v332_v56 }
  0x40   :  { %363 = vmatpush1.bf16.msra.mxu1 %v362_v57  ;;  %334 = vmatprep.subr.bf16.mxu0 %v481_v0 }
  0x41   :  { %365 = vmatprep.subr.bf16.mxu1 %v364_v59 }
  0x43   :  { %336 = vmatpush3.bf16.msra.mxu0 %v335_v2 }
  0x44   :  { %367 = vmatpush1.bf16.msra.mxu1 %v366_v3  ;;  %337 = vmatprep.subr.bf16.mxu0 %v481_v0 }
  0x45   :  { %369 = vmatprep.subr.bf16.mxu1 %v368_v5 }
  0x47   :  { %339 = vmatpush3.bf16.msra.mxu0 %v338_v9 }
  0x48   :  { %371 = vmatpush1.bf16.msra.mxu1 %v370_v10 }
  0x4a   :  { %314 = vmatmul.mubr.f32.vlgmr.msra.gmra.mrb[0].mxu0 %v41_v11 }
  0x4b   :  { %225 = vmatmul.mubr.f32.vlgmr.msra.gmra.mrb[0].mxu1 %v41_v11 }
 0x11d   :  { %v124_v12 = vpop.f32.mrb[0].mxu0 }
 0x11e   :  { %v226_v13 = vpop.f32.mrb[0].mxu1  ;;  %231 = vst [vmem:[#allocation7] sm:$0xff] %v124_v12  ;;  %v315_v14 = vpop.f32.mrb[1].mxu0 }
 0x11f   :  { %232 = vst [vmem:[#allocation8] sm:$0xff] %v226_v13  ;;  %v228_v15 = vpop.f32.mrb[1].mxu1 }
 0x120   :  { %233 = vst [vmem:[#allocation8 + $0x8] sm:$0xff] %v228_v15 }
 0x121   :  { %436 = shalt.err (!%p433_p6)
}
 0x122   :  { %s437_s16 = scalar_lea.hbm %s578_s2, 128 }
 0x123   :  { %p438_p7 = scmp.ne.s32.totalorder %s578_s2, %s437_s16  ;;  %p441_p8 = scmp.lt.u32.totalorder %s437_s16, %s578_s2 }
 0x125   :  { %p443_p9 = pnand %p441_p8, %p438_p7 }
 0x127   :  { %446 = shalt.err (!%p443_p9)
}
 0x128   :  { %243 = dma.vmem_to_hbm [thread:$0]  %s241_s10, 128, %s578_s2, [#allocation4]  }
 0x129   :  { %s447_s23 = scalar_lea.vmem %s545_s12, 256  ;;  %p452_p11 = scmp.lt.s32.totalorder %s545_s12, %s545_s12 }
 0x12a   :  { %p448_p10 = scmp.ne.s32.totalorder %s545_s12, %s447_s23  ;;  %p453_p12 = scmp.lt.s32.totalorder %s447_s23, %s447_s23 }
 0x12c   :  { %p454_p13 = por %p453_p12, %p452_p11 }
 0x12e   :  { %p455_p0 = pnand %p454_p13, %p448_p10 }
 0x130   :  { %458 = shalt.err (!%p455_p0)
}
 0x131   :  { %s459_s26 = scalar_lea.hbm %s579_s3, 256 }
 0x132   :  { %p460_p1 = scmp.ne.s32.totalorder %s579_s3, %s459_s26  ;;  %p463_p2 = scmp.lt.u32.totalorder %s459_s26, %s579_s3 }
 0x134   :  { %p465_p3 = pnand %p463_p2, %p460_p1 }
 0x136   :  { %468 = shalt.err (!%p465_p3)
}
 0x137   :  { %253 = dma.vmem_to_hbm [thread:$0]  %s545_s12, 256, %s579_s3, [#allocation9]  }
 0x138   :  { %473 = dma.done.wait [#allocation4], 128  }
 0x139   :  { %474 = vsyncadd [#allocation4], 4294967168 }
 0x13a   :  { %475 = dma.done.wait [#allocation9], 256  }
 0x13b   :  { %476 = vsyncadd [#allocation9], 4294967040 }
 0x13c   :  { %260 = vsyncpa [#allocation3], 1 }
 0x13d   :  { %261 = vsyncpa [#allocation6], 1 }
 0x13e   :  { %262 = vsyncpa [#allocation4], 1 }
 0x13f   :  { %263 = vsyncpa [#allocation9], 1 }

</bundles_post_ra>
